<compile_context>
chip_gen: v6e
topology: v6e:2x2x1
jax: 0.10.0
libtpu: 0.0.40
codegen_flags: <defaults>
</compile_context>

<pallas_src>
import functools
import random

import jax
import jax.numpy as jnp
from jax.experimental import pallas as pl
from jax.experimental.pallas import tpu as pltpu


def _triplet_kernel(ip_ref, ineg_ref, feat_ref,       # inputs (VMEM)
                    acc_out_ref, loss_out_ref,        # (1, 1) SMEM scalar outputs
                    sum_acc,                          # (2,) SMEM running sums
                    *, margin, p, n_total, tile_n):
    i = pl.program_id(0)
    num_steps = pl.num_programs(0)

    @pl.when(i == 0)
    def _():
        sum_acc[0] = jnp.float32(0.0)   # loss sum
        sum_acc[1] = jnp.float32(0.0)   # correct count

    # Features are VMEM-resident (constant index_map -> fetched once).
    feat = feat_ref[...].astype(jnp.float32)                        # (N, D)

    # Anchors for this tile: a contiguous row slice of the resident block.
    start = pl.multiple_of(i * tile_n, tile_n)
    a = feat_ref[pl.ds(start, tile_n), :].astype(jnp.float32)       # (tile_n, D)

    # In-VMEM gather via one-hot matmul on the (otherwise idle) MXU.
    col_ids = jax.lax.broadcasted_iota(jnp.int32, (tile_n, n_total), 1)
    oh_pos = (ip_ref[...] == col_ids).astype(jnp.float32)           # (tile_n, N)
    oh_neg = (ineg_ref[...] == col_ids).astype(jnp.float32)
    pos = jnp.dot(oh_pos, feat, preferred_element_type=jnp.float32)  # (tile_n, D)
    neg = jnp.dot(oh_neg, feat, preferred_element_type=jnp.float32)

    diff_pos = a - pos
    diff_neg = a - neg
    eps = jnp.float32(1e-6)   # F.pairwise_distance eps

    if p == 2:
        # One squared-sum per branch; eps-shifted distance derived algebraically:
        #   sum((x+eps)^2) = sum(x^2) + 2*eps*sum(x) + D*eps^2
        d_f = jnp.float32(feat.shape[-1])
        s_pos = jnp.sum(diff_pos * diff_pos, axis=-1, keepdims=True)
        s_neg = jnp.sum(diff_neg * diff_neg, axis=-1, keepdims=True)
        t_pos = jnp.sum(diff_pos, axis=-1, keepdims=True)
        t_neg = jnp.sum(diff_neg, axis=-1, keepdims=True)
        shift = d_f * eps * eps
        d_pos = jnp.sqrt(jnp.maximum(s_pos + 2.0 * eps * t_pos + shift, 0.0))
        d_neg = jnp.sqrt(jnp.maximum(s_neg + 2.0 * eps * t_neg + shift, 0.0))
        # accuracy: sqrt is monotone on non-negative sums (no eps in reference).
        correct = (s_pos < s_neg).astype(jnp.float32)
    else:
        # Generic fallback (integer_pow for the element-wise power; faithful to
        # the reference accuracy formula, including its odd-p NaN behavior).
        inv_p = jnp.float32(1.0 / p)
        d_pos = jnp.power(jnp.sum(jnp.abs(diff_pos + eps) ** p, axis=-1, keepdims=True), inv_p)
        d_neg = jnp.power(jnp.sum(jnp.abs(diff_neg + eps) ** p, axis=-1, keepdims=True), inv_p)
        a_pos = jnp.sqrt(jnp.sum(diff_pos ** p, axis=-1, keepdims=True))
        a_neg = jnp.sqrt(jnp.sum(diff_neg ** p, axis=-1, keepdims=True))
        correct = (a_pos < a_neg).astype(jnp.float32)

    per_loss = jnp.maximum(d_pos - d_neg + jnp.float32(margin), 0.0)   # (tile_n, 1)

    sum_acc[0] = sum_acc[0] + jnp.sum(per_loss)
    sum_acc[1] = sum_acc[1] + jnp.sum(correct)

    @pl.when(i == num_steps - 1)
    def _():
        inv_n = jnp.float32(1.0 / n_total)
        acc_out_ref[0, 0] = sum_acc[1] * inv_n
        loss_out_ref[0, 0] = sum_acc[0] * inv_n


def _vmem_budget_bytes():
    """Per-generation scoped-VMEM budget (v5e/v6e: 128 MiB, v7x: 64 MiB physical)."""
    try:
        cap = int(pltpu.get_tpu_info().vmem_capacity_bytes)
    except Exception:
        cap = 64 << 20
    return max(int(cap * 0.45), 16 << 20)


def _pick_tile_n(n, d, itemsize, *, vmem_budget_bytes):
    """Largest legal anchor tile under the VMEM budget (whole N if it fits)."""
    resident = n * d * itemsize            # VMEM-resident features
    headroom = 1 << 20
    avail = vmem_budget_bytes - resident - headroom
    # per anchor-row working set: f32 temporaries (a/pos/neg/diffs/one-hots)
    per_row = 8 * d * 4 + 2 * n * 4 + 32
    if avail >= n * per_row:
        return n                           # single grid step
    cap = max(avail // per_row, 8)
    t = (int(min(cap, n)) // 8) * 8
    while t >= 8:
        if n % t == 0:
            return t
        t -= 8
    return n                               # fallback: single full block


def triplet_loss_pallas(features, idx_pos, idx_neg, *, margin=1.0, p=2, tile_n=None):
    """features: (N, D) float32; idx_pos/idx_neg: (N,) int32 gather indices."""
    n, d = features.shape
    itemsize = features.dtype.itemsize
    vmem_budget = _vmem_budget_bytes()

    if tile_n is None:
        tile_n = _pick_tile_n(n, d, itemsize, vmem_budget_bytes=vmem_budget)
    if n % tile_n != 0:
        raise ValueError(f"tile_n={tile_n} must divide N={n}")
    if tile_n != n and tile_n % 8 != 0:
        raise ValueError("tile_n must be a multiple of 8 (sublane tile) or equal N")
    num_tiles = n // tile_n

    idx_pos2 = jnp.asarray(idx_pos, jnp.int32).reshape(n, 1)
    idx_neg2 = jnp.asarray(idx_neg, jnp.int32).reshape(n, 1)

    kernel = functools.partial(
        _triplet_kernel, margin=float(margin), p=int(p), n_total=n, tile_n=tile_n)

    grid_spec = pltpu.PrefetchScalarGridSpec(
        num_scalar_prefetch=0,
        grid=(num_tiles,),
        in_specs=[
            # per-tile gather indices (tiny pipelined blocks)
            pl.BlockSpec((tile_n, 1), lambda i: (i, 0)),
            pl.BlockSpec((tile_n, 1), lambda i: (i, 0)),
            # features: whole array VMEM-resident (constant index_map -> one DMA)
            pl.BlockSpec((n, d), lambda i: (0, 0)),
        ],
        out_specs=(
            pl.BlockSpec(memory_space=pltpu.MemorySpace.SMEM),   # accuracy (1,1)
            pl.BlockSpec(memory_space=pltpu.MemorySpace.SMEM),   # loss     (1,1)
        ),
        scratch_shapes=[
            pltpu.SMEM((2,), jnp.float32),   # running [loss_sum, correct_sum]
        ],
    )

    acc, loss = pl.pallas_call(
        kernel,
        grid_spec=grid_spec,
        out_shape=(
            jax.ShapeDtypeStruct((1, 1), jnp.float32),    # accuracy
            jax.ShapeDtypeStruct((1, 1), jnp.float32),    # loss
        ),
        compiler_params=pltpu.CompilerParams(
            dimension_semantics=("arbitrary",),           # sequential reduction over tiles
            vmem_limit_bytes=vmem_budget),
        cost_estimate=pl.CostEstimate(
            flops=4 * n * n * d + 12 * n * d,
            transcendentals=2 * n,
            bytes_accessed=n * d * itemsize + 2 * n * 4 + 8),
    )(idx_pos2, idx_neg2, features)
    return acc[0, 0], loss[0, 0]


def make_triplet_indices(n, k, seed=0):
    """Deterministic replacement for the module's random.choice index picking."""
    # TODO(synk): Python random.choice has no in-kernel equivalent; indices are
    # drawn host-side (deterministically) and used as gather indices.
    rng = random.Random(seed)
    num = n // k
    idx_pos, idx_neg = [], []
    for i in range(n):
        g = i // num
        pos_cands = [j for j in range(g * num, (g + 1) * num) if j != i]
        neg_cands = [j for j in range(n) if j // num != g]
        idx_pos.append(rng.choice(pos_cands))
        idx_neg.append(rng.choice(neg_cands))
    return jnp.asarray(idx_pos, jnp.int32), jnp.asarray(idx_neg, jnp.int32)


def _reference(features, idx_pos, idx_neg, margin=1.0, p=2):
    """Pure-JAX reference for correctness checking (mirrors the torch module)."""
    a = features
    pos = features[idx_pos]
    neg = features[idx_neg]
    eps = 1e-6
    d_pos = jnp.sum(jnp.abs(a - pos + eps) ** p, axis=-1) ** (1.0 / p)
    d_neg = jnp.sum(jnp.abs(a - neg + eps) ** p, axis=-1) ** (1.0 / p)
    loss = jnp.mean(jnp.maximum(d_pos - d_neg + margin, 0.0))
    acc = jnp.mean((jnp.sqrt(jnp.sum((a - pos) ** p, -1))
                    < jnp.sqrt(jnp.sum((a - neg) ** p, -1))).astype(jnp.float32))
    return acc, loss


if __name__ == "__main__":
    k = 4            # number of transformations
    num = 8          # samples per transformation ("batch_size")
    N = k * num      # total rows = 32
    D = 32           # feature_dim
    margin, p = 1.0, 2

    key = jax.random.PRNGKey(0)
    features = jax.random.normal(key, (N, D), dtype=jnp.float32)
    idx_pos, idx_neg = make_triplet_indices(N, k, seed=0)

    ref_acc, ref_loss = _reference(features, idx_pos, idx_neg, margin, p)

    # Fast path: auto tile (single grid step, features fully VMEM-resident).
    acc, loss = triplet_loss_pallas(features, idx_pos, idx_neg, margin=margin, p=p)
    acc, loss = jax.block_until_ready((acc, loss))
    assert jnp.allclose(acc, ref_acc, atol=1e-5), (acc, ref_acc)
    assert jnp.allclose(loss, ref_loss, atol=1e-5), (loss, ref_loss)

    # Multi-step path: tile_n=8 -> 4 grid steps, exercises the SMEM accumulator
    # and the pl.when init/finalize with the resident features block.
    acc_t, loss_t = triplet_loss_pallas(features, idx_pos, idx_neg,
                                        margin=margin, p=p, tile_n=8)
    acc_t, loss_t = jax.block_until_ready((acc_t, loss_t))
    assert jnp.allclose(acc_t, ref_acc, atol=1e-5), (acc_t, ref_acc)
    assert jnp.allclose(loss_t, ref_loss, atol=1e-5), (loss_t, ref_loss)

    print("KERNEL_OK")
</pallas_src>

<mosaic_0001>
module attributes {stable_mosaic.version = 11 : i64} {
  func.func @_triplet_kernel(%arg0: i32, %arg1: memref<32x1xi32, #tpu.memory_space<vmem>>, %arg2: memref<32x1xi32, #tpu.memory_space<vmem>>, %arg3: memref<32x32xf32, #tpu.memory_space<vmem>>, %arg4: memref<1x1xf32, #tpu.memory_space<smem>>, %arg5: memref<1x1xf32, #tpu.memory_space<smem>>, %arg6: memref<2xf32, #tpu.memory_space<smem>>) attributes {dimension_semantics = [#tpu.dimension_semantics<arbitrary>], iteration_bounds = array<i64: 1>, scalar_prefetch = 0 : i64, scratch_operands = 1 : i64, tpu.core_type = #tpu.core_type<tc>, window_params = [{transform_indices = @transform_0, window_bounds = array<i64: 32, 1>}, {transform_indices = @transform_1, window_bounds = array<i64: 32, 1>}, {pipeline_mode = #tpu.pipeline_mode<synchronous>, transform_indices = @transform_2, window_bounds = array<i64: 32, 32>}, {transform_indices = @transform_3, window_bounds = array<i64: 1, 1>}, {transform_indices = @transform_4, window_bounds = array<i64: 1, 1>}]} {
    %c0_i32 = arith.constant 0 : i32
    %0 = arith.cmpi eq, %arg0, %c0_i32 : i32
    %1 = arith.extui %0 : i1 to i32
    %c0_i32_0 = arith.constant 0 : i32
    %2 = arith.cmpi ne, %1, %c0_i32_0 : i32
    scf.if %2 {
      %cst_30 = arith.constant 0.000000e+00 : f32
      %c0_31 = arith.constant 0 : index
      %78 = memref.load %arg6[%c0_31] : memref<2xf32, #tpu.memory_space<smem>>
      memref.store %cst_30, %arg6[%c0_31] : memref<2xf32, #tpu.memory_space<smem>>
      %cst_32 = arith.constant 0.000000e+00 : f32
      %c1_33 = arith.constant 1 : index
      %79 = memref.load %arg6[%c1_33] : memref<2xf32, #tpu.memory_space<smem>>
      memref.store %cst_32, %arg6[%c1_33] : memref<2xf32, #tpu.memory_space<smem>>
    } else {
    }
    %c0 = arith.constant 0 : index
    %c0_1 = arith.constant 0 : index
    %3 = vector.load %arg3[%c0, %c0_1] : memref<32x32xf32, #tpu.memory_space<vmem>>, vector<32x32xf32>
    %c32_i32 = arith.constant 32 : i32
    %4 = arith.muli %arg0, %c32_i32 : i32
    %5 = tpu.assume_multiple %4, 32 : i32
    %6 = arith.index_cast %5 : i32 to index
    %c0_2 = arith.constant 0 : index
    %7 = vector.load %arg3[%6, %c0_2] : memref<32x32xf32, #tpu.memory_space<vmem>>, vector<32x32xf32>
    %8 = tpu.iota {dimensions = array<i32: 1>} : vector<32x32xi32>
    %c0_3 = arith.constant 0 : index
    %c0_4 = arith.constant 0 : index
    %9 = vector.load %arg1[%c0_3, %c0_4] : memref<32x1xi32, #tpu.memory_space<vmem>>, vector<32x1xi32>
    %10 = vector.broadcast %9 : vector<32x1xi32> to vector<32x32xi32>
    %11 = arith.cmpi eq, %10, %8 : vector<32x32xi32>
    %12 = arith.extui %11 : vector<32x32xi1> to vector<32x32xi32>
    %13 = arith.sitofp %12 : vector<32x32xi32> to vector<32x32xf32>
    %c0_5 = arith.constant 0 : index
    %c0_6 = arith.constant 0 : index
    %14 = vector.load %arg2[%c0_5, %c0_6] : memref<32x1xi32, #tpu.memory_space<vmem>>, vector<32x1xi32>
    %15 = vector.broadcast %14 : vector<32x1xi32> to vector<32x32xi32>
    %16 = arith.cmpi eq, %15, %8 : vector<32x32xi32>
    %17 = arith.extui %16 : vector<32x32xi1> to vector<32x32xi32>
    %18 = arith.sitofp %17 : vector<32x32xi32> to vector<32x32xf32>
    %cst = arith.constant dense<0.000000e+00> : vector<32x32xf32>
    %19 = tpu.matmul %13, %3, %cst {dimension_numbers = #tpu.dot_dimension_numbers<[1], [0], [0], [1], [0, 0, 1, 1], [], []>} : vector<32x32xf32>, vector<32x32xf32>, vector<32x32xf32> -> vector<32x32xf32>
    %cst_7 = arith.constant dense<0.000000e+00> : vector<32x32xf32>
    %20 = tpu.matmul %18, %3, %cst_7 {dimension_numbers = #tpu.dot_dimension_numbers<[1], [0], [0], [1], [0, 0, 1, 1], [], []>} : vector<32x32xf32>, vector<32x32xf32>, vector<32x32xf32> -> vector<32x32xf32>
    %21 = arith.subf %7, %19 : vector<32x32xf32>
    %22 = arith.subf %7, %20 : vector<32x32xf32>
    %23 = arith.mulf %21, %21 : vector<32x32xf32>
    %cst_8 = arith.constant dense<0.000000e+00> : vector<32xf32>
    %24 = vector.multi_reduction <add>, %23, %cst_8 [1] : vector<32x32xf32> to vector<32xf32>
    %25 = vector.shape_cast %24 : vector<32xf32> to vector<32x1xf32>
    %26 = arith.mulf %22, %22 : vector<32x32xf32>
    %cst_9 = arith.constant dense<0.000000e+00> : vector<32xf32>
    %27 = vector.multi_reduction <add>, %26, %cst_9 [1] : vector<32x32xf32> to vector<32xf32>
    %28 = vector.shape_cast %27 : vector<32xf32> to vector<32x1xf32>
    %cst_10 = arith.constant dense<0.000000e+00> : vector<32xf32>
    %29 = vector.multi_reduction <add>, %21, %cst_10 [1] : vector<32x32xf32> to vector<32xf32>
    %30 = vector.shape_cast %29 : vector<32xf32> to vector<32x1xf32>
    %cst_11 = arith.constant dense<0.000000e+00> : vector<32xf32>
    %31 = vector.multi_reduction <add>, %22, %cst_11 [1] : vector<32x32xf32> to vector<32xf32>
    %32 = vector.shape_cast %31 : vector<32xf32> to vector<32x1xf32>
    %cst_12 = arith.constant 3.200000e+01 : f32
    %cst_13 = arith.constant 9.99999997E-7 : f32
    %33 = arith.mulf %cst_12, %cst_13 : f32
    %cst_14 = arith.constant 9.99999997E-7 : f32
    %34 = arith.mulf %33, %cst_14 : f32
    %cst_15 = arith.constant 2.000000e+00 : f32
    %cst_16 = arith.constant 9.99999997E-7 : f32
    %35 = arith.mulf %cst_15, %cst_16 : f32
    %36 = vector.broadcast %35 : f32 to vector<32x1xf32>
    %37 = arith.mulf %36, %30 : vector<32x1xf32>
    %38 = arith.addf %25, %37 : vector<32x1xf32>
    %39 = vector.broadcast %34 : f32 to vector<32x1xf32>
    %40 = arith.addf %38, %39 : vector<32x1xf32>
    %cst_17 = arith.constant 0.000000e+00 : f32
    %41 = vector.broadcast %cst_17 : f32 to vector<32x1xf32>
    %42 = arith.maximumf %40, %41 : vector<32x1xf32>
    %43 = math.sqrt %42 : vector<32x1xf32>
    %cst_18 = arith.constant 2.000000e+00 : f32
    %cst_19 = arith.constant 9.99999997E-7 : f32
    %44 = arith.mulf %cst_18, %cst_19 : f32
    %45 = vector.broadcast %44 : f32 to vector<32x1xf32>
    %46 = arith.mulf %45, %32 : vector<32x1xf32>
    %47 = arith.addf %28, %46 : vector<32x1xf32>
    %48 = vector.broadcast %34 : f32 to vector<32x1xf32>
    %49 = arith.addf %47, %48 : vector<32x1xf32>
    %cst_20 = arith.constant 0.000000e+00 : f32
    %50 = vector.broadcast %cst_20 : f32 to vector<32x1xf32>
    %51 = arith.maximumf %49, %50 : vector<32x1xf32>
    %52 = math.sqrt %51 : vector<32x1xf32>
    %53 = arith.cmpf olt, %25, %28 : vector<32x1xf32>
    %54 = arith.extui %53 : vector<32x1xi1> to vector<32x1xi32>
    %55 = arith.sitofp %54 : vector<32x1xi32> to vector<32x1xf32>
    %56 = arith.subf %43, %52 : vector<32x1xf32>
    %cst_21 = arith.constant 1.000000e+00 : f32
    %57 = vector.broadcast %cst_21 : f32 to vector<32x1xf32>
    %58 = arith.addf %56, %57 : vector<32x1xf32>
    %cst_22 = arith.constant 0.000000e+00 : f32
    %59 = vector.broadcast %cst_22 : f32 to vector<32x1xf32>
    %60 = arith.maximumf %58, %59 : vector<32x1xf32>
    %c0_23 = arith.constant 0 : index
    %61 = memref.load %arg6[%c0_23] : memref<2xf32, #tpu.memory_space<smem>>
    %62 = vector.shape_cast %60 : vector<32x1xf32> to vector<1x32x1xf32>
    %cst_24 = arith.constant dense<0.000000e+00> : vector<1xf32>
    %63 = vector.multi_reduction <add>, %62, %cst_24 [1, 2] : vector<1x32x1xf32> to vector<1xf32>
    %64 = vector.shape_cast %63 : vector<1xf32> to vector<1x1x1xf32>
    %65 = vector.extract %64[0, 0, 0] : f32 from vector<1x1x1xf32>
    %66 = arith.addf %61, %65 : f32
    %c0_25 = arith.constant 0 : index
    %67 = memref.load %arg6[%c0_25] : memref<2xf32, #tpu.memory_space<smem>>
    memref.store %66, %arg6[%c0_25] : memref<2xf32, #tpu.memory_space<smem>>
    %c1 = arith.constant 1 : index
    %68 = memref.load %arg6[%c1] : memref<2xf32, #tpu.memory_space<smem>>
    %69 = vector.shape_cast %55 : vector<32x1xf32> to vector<1x32x1xf32>
    %cst_26 = arith.constant dense<0.000000e+00> : vector<1xf32>
    %70 = vector.multi_reduction <add>, %69, %cst_26 [1, 2] : vector<1x32x1xf32> to vector<1xf32>
    %71 = vector.shape_cast %70 : vector<1xf32> to vector<1x1x1xf32>
    %72 = vector.extract %71[0, 0, 0] : f32 from vector<1x1x1xf32>
    %73 = arith.addf %68, %72 : f32
    %c1_27 = arith.constant 1 : index
    %74 = memref.load %arg6[%c1_27] : memref<2xf32, #tpu.memory_space<smem>>
    memref.store %73, %arg6[%c1_27] : memref<2xf32, #tpu.memory_space<smem>>
    %c0_i32_28 = arith.constant 0 : i32
    %75 = arith.cmpi eq, %arg0, %c0_i32_28 : i32
    %76 = arith.extui %75 : i1 to i32
    %c0_i32_29 = arith.constant 0 : i32
    %77 = arith.cmpi ne, %76, %c0_i32_29 : i32
    scf.if %77 {
      %c1_30 = arith.constant 1 : index
      %78 = memref.load %arg6[%c1_30] : memref<2xf32, #tpu.memory_space<smem>>
      %cst_31 = arith.constant 3.125000e-02 : f32
      %79 = arith.mulf %78, %cst_31 : f32
      %c0_32 = arith.constant 0 : index
      %c0_33 = arith.constant 0 : index
      %80 = memref.load %arg4[%c0_32, %c0_33] : memref<1x1xf32, #tpu.memory_space<smem>>
      memref.store %79, %arg4[%c0_32, %c0_33] : memref<1x1xf32, #tpu.memory_space<smem>>
      %c0_34 = arith.constant 0 : index
      %81 = memref.load %arg6[%c0_34] : memref<2xf32, #tpu.memory_space<smem>>
      %cst_35 = arith.constant 3.125000e-02 : f32
      %82 = arith.mulf %81, %cst_35 : f32
      %c0_36 = arith.constant 0 : index
      %c0_37 = arith.constant 0 : index
      %83 = memref.load %arg5[%c0_36, %c0_37] : memref<1x1xf32, #tpu.memory_space<smem>>
      memref.store %82, %arg5[%c0_36, %c0_37] : memref<1x1xf32, #tpu.memory_space<smem>>
    } else {
    }
    return
  }
  func.func @transform_0(%arg0: i32) -> (i32, i32) {
    %c0_i32 = arith.constant 0 : i32
    %c0_i32_0 = arith.constant 0 : i32
    return %arg0, %c0_i32 : i32, i32
  }
  func.func @transform_1(%arg0: i32) -> (i32, i32) {
    %c0_i32 = arith.constant 0 : i32
    %c0_i32_0 = arith.constant 0 : i32
    return %arg0, %c0_i32 : i32, i32
  }
  func.func @transform_2(%arg0: i32) -> (i32, i32) {
    %c0_i32 = arith.constant 0 : i32
    %c0_i32_0 = arith.constant 0 : i32
    %c0_i32_1 = arith.constant 0 : i32
    return %c0_i32, %c0_i32_0 : i32, i32
  }
  func.func @transform_3(%arg0: i32) -> (i32, i32) {
    %c0_i32 = arith.constant 0 : i32
    %c0_i32_0 = arith.constant 0 : i32
    %c0_i32_1 = arith.constant 0 : i32
    return %c0_i32, %c0_i32_0 : i32, i32
  }
  func.func @transform_4(%arg0: i32) -> (i32, i32) {
    %c0_i32 = arith.constant 0 : i32
    %c0_i32_0 = arith.constant 0 : i32
    %c0_i32_1 = arith.constant 0 : i32
    return %c0_i32, %c0_i32_0 : i32, i32
  }
}

</mosaic_0001>

<bundles_post_ra>
// kernel: tpu_custom_call.1
= control target key start
LH: loop header
LB: loop body
LE: loop exit
PB: predicated region body
PF: predicated region fallthrough
CT: control target
= control target key end

     0   :  { %10 = vsyncpa [#allocation4], 0  ;;  %v654_v2 = vmov 0   ;;  %s841_s0 = inlined_call_operand.vmem [shape: s32[32,1], index: 0, kind: input, shape index: {}]   ;;  %s842_s1 = inlined_call_operand.vmem [shape: s32[32,1], index: 1, kind: input, shape index: {}]   ;;  %s843_s2 = inlined_call_operand.vmem [shape: f32[32,32], index: 2, kind: input, shape index: {}]   ;;  %s844_s3 = inlined_call_operand.hbm [shape: f32[1,1], index: 3, kind: output, shape index: {0}]   ;;  %s845_s4 = inlined_call_operand.hbm [shape: f32[1,1], index: 4, kind: output, shape index: {1}]  }
   0x1   :  { %v39_v0 = vld [vmem:[%s841_s0 + $0x8] sm:$0xff]  ;;  %v38_v1 = vld [vmem:[%s841_s0] sm:$0xff]  ;;  %617 = vset.pattern.permute.xlu1 %v654_v2  ;;  %616 = vset.pattern.permute.xlu0 %v654_v2  ;;  %v692_v3 = vld [vmem:[%s843_s2 + $0x18] sm:$0xff] }
   0x2   :  { %46 = vperm.xlu1 %617, %v39_v0   ;;  %43 = vperm.xlu0 %616, %v38_v1   ;;  %v67_v4 = vld [vmem:[%s842_s1 + $0x8] sm:$0xff]  ;;  %v66_v5 = vld [vmem:[%s842_s1] sm:$0xff]  ;;  %v704_v6 = vld [vmem:[%s843_s2 + $0x10] sm:$0xff] }
   0x3   :  { %580 = vmatprep.subr.mxu0 %v692_v3  ;;  %594 = vmatprep.subr.mxu1 %v692_v3 }
   0x4   :  { %581 = vmatpush3.msra.mxu0 %v692_v3  ;;  %595 = vmatpush3.msra.mxu1 %v692_v3 }
   0x5   :  { %11 = vsyncpa [#allocation6], 0  ;;  %582 = vmatprep.subr.mxu0 %v704_v6  ;;  %v713_v7 = vld [vmem:[%s843_s2 + $0x8] sm:$0xff]  ;;  %596 = vmatprep.subr.mxu1 %v704_v6  ;;  %v68_v8 = vld [vmem:[%s842_s1 + $0x10] sm:$0xff]  ;;  %v36_v13 = vlaneseq  ;;  %vm94_vm0 = vcmask 261120   ;;  %v655_v17 = vmov 0.0  }
   0x6   :  { %74 = vperm.xlu1 %617, %v67_v4   ;;  %71 = vperm.xlu0 %616, %v66_v5   ;;  %v40_v9 = vld [vmem:[%s841_s0 + $0x10] sm:$0xff]  ;;  %v26_v10 = vld [vmem:[%s843_s2] sm:$0xff]  ;;  %v69_v11 = vld [vmem:[%s842_s1 + $0x18] sm:$0xff]  ;;  %vm466_vm11 = vcmask 7168   ;;  %s656_s14 = smov [#allocation3]   ;;  %s657_s17 = smov [#allocation5]  }
   0x7   :  { %583 = vmatpush3.msra.mxu0 %v704_v6  ;;  %597 = vmatpush3.msra.mxu1 %v704_v6  ;;  %v41_v12 = vld [vmem:[%s841_s0 + $0x18] sm:$0xff]  ;;  %v37_v14 = vand.u32 127, %v36_v13 }
   0x8   :  { %584 = vmatprep.subr.mxu0 %v713_v7  ;;  %598 = vmatprep.subr.mxu1 %v713_v7 }
   0x9   :  { %585 = vmatpush3.msra.mxu0 %v713_v7  ;;  %599 = vmatpush3.msra.mxu1 %v713_v7 }
   0xa   :  { %77 = vperm.xlu1 %617, %v68_v8   ;;  %49 = vperm.xlu0 %616, %v40_v9  }
   0xb   :  { %586 = vmatprep.subr.mxu0 %v26_v10  ;;  %600 = vmatprep.subr.mxu1 %v26_v10 }
   0xc   :  { %587 = vmatpush3.msra.mxu0 %v26_v10  ;;  %601 = vmatpush3.msra.mxu1 %v26_v10 }
   0xe   :  { %80 = vperm.xlu1 %617, %v69_v11   ;;  %52 = vperm.xlu0 %616, %v41_v12  }
  0x7d   :  { %v47_v15 = vpop.permute.xlu1 %46  ;;  %v44_v16 = vpop.permute.xlu0 %43 }
  0x7e   :  { %vm55_vm1 = vcmp.eq.s32.totalorder %v47_v15, %v37_v14  ;;  %vm54_vm2 = vcmp.eq.s32.totalorder %v44_v16, %v37_v14 }
  0x7f   :  { %v543_v18 = vsel %vm55_vm1, 1.0, %v655_v17  ;;  %v542_v19 = vsel %vm54_vm2, 1.0, %v655_v17 }
  0x80   :  { %588 = vmatprep.mubr.msk.f32.mxu0 %vm94_vm0, %v542_v19 }
  0x81   :  { %v75_v20 = vpop.permute.xlu1 %74  ;;  %v72_v21 = vpop.permute.xlu0 %71  ;;  %589 = vmatmul.mubr.msk.f32.vlgmr.msra.gmra.mxu0 %vm94_vm0, %v543_v18 }
  0x82   :  { %vm83_vm3 = vcmp.eq.s32.totalorder %v75_v20, %v37_v14  ;;  %vm82_vm4 = vcmp.eq.s32.totalorder %v72_v21, %v37_v14 }
  0x83   :  { %v547_v22 = vsel %vm83_vm3, 1.0, %v655_v17  ;;  %v546_v23 = vsel %vm82_vm4, 1.0, %v655_v17 }
  0x84   :  { %602 = vmatprep.mubr.msk.f32.mxu1 %vm94_vm0, %v546_v23 }
  0x85   :  { %v78_v24 = vpop.permute.xlu1 %77  ;;  %v50_v25 = vpop.permute.xlu0 %49  ;;  %603 = vmatmul.mubr.msk.f32.vlgmr.msra.gmra.mxu1 %vm94_vm0, %v547_v22 }
  0x86   :  { %vm84_vm5 = vcmp.eq.s32.totalorder %v78_v24, %v37_v14  ;;  %vm56_vm6 = vcmp.eq.s32.totalorder %v50_v25, %v37_v14 }
  0x87   :  { %v548_v26 = vsel %vm84_vm5, 1.0, %v655_v17  ;;  %v544_v27 = vsel %vm56_vm6, 1.0, %v655_v17 }
  0x88   :  { %591 = vmatprep.mubr.msk.f32.mxu0 %vm94_vm0, %v544_v27  ;;  %605 = vmatprep.mubr.msk.f32.mxu1 %vm94_vm0, %v548_v26 }
  0x89   :  { %v81_v28 = vpop.permute.xlu1 %80  ;;  %v53_v29 = vpop.permute.xlu0 %52 }
  0x8a   :  { %vm85_vm7 = vcmp.eq.s32.totalorder %v81_v28, %v37_v14  ;;  %vm57_vm8 = vcmp.eq.s32.totalorder %v53_v29, %v37_v14 }
  0x8b   :  { %v549_v30 = vsel %vm85_vm7, 1.0, %v655_v17  ;;  %v545_v31 = vsel %vm57_vm8, 1.0, %v655_v17 }
  0x8c   :  { %592 = vmatmul.mubr.msk.f32.gmra.mxu0 %vm94_vm0, %v545_v31  ;;  %606 = vmatmul.mubr.msk.f32.gmra.mxu1 %vm94_vm0, %v549_v30 }
 0x141   :  { %v590_v32 = vpop.f32.mrf.mxu0 }
 0x142   :  { %v290_v33 = vsub.f32 %v713_v7, %v590_v32 }
 0x143   :  { %v173_v34 = vpop.f32.mrf.mxu0 }
 0x144   :  { %v289_v35 = vsub.f32 %v26_v10, %v173_v34  ;;  %v332_v36 = vsel %vm94_vm0, %v290_v33, 0.0  ;;  %v298_v53 = vmul.f32 %v290_v33, %v290_v33 }
 0x145   :  { %v604_v37 = vpop.f32.mrf.mxu1  ;;  %333 = vadd.xlane.f32.xlu1 %v332_v36 }
 0x146   :  { %v294_v38 = vsub.f32 %v713_v7, %v604_v37  ;;  %v297_v39 = vmul.f32 %v289_v35, %v289_v35  ;;  %v329_v46 = vsel %vm94_vm0, %v289_v35, 0.0  ;;  %v304_v54 = vsel %vm94_vm0, %v298_v53, 0.0 }
 0x147   :  { %v270_v40 = vpop.f32.mrf.mxu1 }
 0x148   :  { %v293_v41 = vsub.f32 %v26_v10, %v270_v40  ;;  %v344_v42 = vsel %vm94_vm0, %v294_v38, 0.0  ;;  %v301_v43 = vsel %vm94_vm0, %v297_v39, 0.0  ;;  %v314_v56 = vmul.f32 %v294_v38, %v294_v38 }
 0x149   :  { %345 = vadd.xlane.f32.xlu0 %v344_v42  ;;  %302 = vadd.xlane.f32.xlu1 %v301_v43 }
 0x14a   :  { %v313_v44 = vmul.f32 %v293_v41, %v293_v41  ;;  %v341_v52 = vsel %vm94_vm0, %v293_v41, 0.0  ;;  %v320_v60 = vsel %vm94_vm0, %v314_v56, 0.0 }
 0x14c   :  { %v593_v45 = vpop.f32.mrf.mxu0  ;;  %v317_v47 = vsel %vm94_vm0, %v313_v44, 0.0  ;;  %v607_v58 = vpop.f32.mrf.mxu1 }
 0x14d   :  { %v292_v48 = vsub.f32 %v692_v3, %v593_v45  ;;  %330 = vadd.xlane.f32.xlu0 %v329_v46  ;;  %318 = vadd.xlane.f32.xlu1 %v317_v47  ;;  %v296_v59 = vsub.f32 %v692_v3, %v607_v58 }
 0x14e   :  { %v183_v49 = vpop.f32.mrf.mxu0  ;;  %v280_v63 = vpop.f32.mrf.mxu1 }
 0x14f   :  { %v338_v50 = vsel %vm94_vm0, %v292_v48, 0.0  ;;  %v291_v51 = vsub.f32 %v704_v6, %v183_v49  ;;  %v300_v62 = vmul.f32 %v292_v48, %v292_v48  ;;  %v295_v0 = vsub.f32 %v704_v6, %v280_v63 }
 0x150   :  { %v350_v1 = vsel %vm94_vm0, %v296_v59, 0.0  ;;  %v316_v7 = vmul.f32 %v296_v59, %v296_v59 }
 0x151   :  { %342 = vadd.xlane.f32.xlu0 %v341_v52  ;;  %339 = vadd.xlane.f32.xlu1 %v338_v50  ;;  %v335_v55 = vsel %vm94_vm0, %v291_v51, 0.0  ;;  %v299_v57 = vmul.f32 %v291_v51, %v291_v51  ;;  %v310_v2 = vsel %vm94_vm0, %v300_v62, 0.0  ;;  %v347_v4 = vsel %vm94_vm0, %v295_v0, 0.0 }
 0x152   :  { %v315_v5 = vmul.f32 %v295_v0, %v295_v0  ;;  %v326_v8 = vsel %vm94_vm0, %v316_v7, 0.0 }
 0x153   :  { %v307_v61 = vsel %vm94_vm0, %v299_v57, 0.0 }
 0x154   :  { %v323_v3 = vsel %vm94_vm0, %v315_v5, 0.0 }
 0x155   :  { %305 = vadd.xlane.f32.xlu0 %v304_v54  ;;  %336 = vadd.xlane.f32.xlu1 %v335_v55 }
 0x159   :  { %321 = vadd.xlane.f32.xlu0 %v320_v60  ;;  %308 = vadd.xlane.f32.xlu1 %v307_v61 }
 0x15d   :  { %351 = vadd.xlane.f32.xlu0 %v350_v1  ;;  %311 = vadd.xlane.f32.xlu1 %v310_v2 }
 0x161   :  { %348 = vadd.xlane.f32.xlu0 %v347_v4 }
 0x165   :  { %324 = vadd.xlane.f32.xlu0 %v323_v3 }
 0x169   :  { %327 = vadd.xlane.f32.xlu0 %v326_v8 }
 0x1ce   :  { %v334_v9 = vpop.xlane.xlu1 %333 }
 0x1cf   :  { %v354_v19 = vmul.f32 2e-06, %v334_v9 }
 0x1d2   :  { %v346_v10 = vpop.xlane.xlu0 %345  ;;  %v303_v6 = vpop.xlane.xlu1 %302 }
 0x1d3   :  { %v398_v26 = vmul.f32 2e-06, %v346_v10 }
 0x1d6   :  { %v331_v11 = vpop.xlane.xlu0 %330  ;;  %v319_v12 = vpop.xlane.xlu1 %318 }
 0x1d7   :  { %v353_v13 = vmul.f32 2e-06, %v331_v11  ;;  %vm441_vm10 = vcmp.lt.f32.partialorder %v303_v6, %v319_v12 }
 0x1d8   :  { %v558_v48 = vsel %vm441_vm10, 1.0, %v655_v17 }
 0x1d9   :  { %v357_v18 = vadd.f32 %v353_v13, %v303_v6  ;;  %v487_v54 = vsel %vm466_vm11, %v558_v48, 0.0 }
 0x1da   :  { %v343_v14 = vpop.xlane.xlu0 %342  ;;  %v340_v15 = vpop.xlane.xlu1 %339 }
 0x1db   :  { %v397_v16 = vmul.f32 2e-06, %v343_v14  ;;  %v361_v25 = vadd.f32 3.2e-11, %v357_v18  ;;  %v356_v36 = vmul.f32 2e-06, %v340_v15 }
 0x1dd   :  { %v401_v20 = vadd.f32 %v397_v16, %v319_v12  ;;  %v779_v34 = vmax.f32 %v361_v25, 0.0 }
 0x1de   :  { %v306_v21 = vpop.xlane.xlu0 %305  ;;  %v337_v22 = vpop.xlane.xlu1 %336 }
 0x1df   :  { %v405_v23 = vadd.f32 3.2e-11, %v401_v20  ;;  %v358_v24 = vadd.f32 %v354_v19, %v306_v21  ;;  %v355_v29 = vmul.f32 2e-06, %v337_v22  ;;  %vm371_vm2 = vcmp.eq.f32.partialorder %v779_v34, inf }
 0x1e0   :  { %vm373_vm5 = vcmp.eq.f32.partialorder %v779_v34, 0.0 }
 0x1e1   :  { %v362_v27 = vadd.f32 3.2e-11, %v358_v24  ;;  %v775_v28 = vmax.f32 %v405_v23, 0.0 }
 0x1e2   :  { %v322_v30 = vpop.xlane.xlu0 %321  ;;  %v309_v31 = vpop.xlane.xlu1 %308 }
 0x1e3   :  { %v777_v32 = vmax.f32 %v362_v27, 0.0  ;;  %v402_v33 = vadd.f32 %v398_v26, %v322_v30  ;;  %v359_v35 = vadd.f32 %v355_v29, %v309_v31  ;;  %618 = vrsqrt.f32 %v775_v28 }
 0x1e4   :  { %vm442_vm9 = vcmp.lt.f32.partialorder %v306_v21, %v322_v30  ;;  %vm415_vm0 = vcmp.eq.f32.partialorder %v775_v28, inf  ;;  %v418_v18 = vand.u32 2147483648, %v775_v28  ;;  %vm417_vm4 = vcmp.eq.f32.partialorder %v775_v28, 0.0 }
 0x1e5   :  { %v406_v37 = vadd.f32 3.2e-11, %v402_v33  ;;  %620 = vrsqrt.f32 %v777_v32  ;;  %v363_v41 = vadd.f32 3.2e-11, %v359_v35  ;;  %v559_v44 = vsel %vm442_vm9, 1.0, %v655_v17 }
 0x1e6   :  { %v352_v38 = vpop.xlane.xlu0 %351  ;;  %v312_v39 = vpop.xlane.xlu1 %311  ;;  %622 = vrsqrt.f32 %v779_v34  ;;  %v488_v49 = vsel %vm466_vm11, %v559_v44, 0.0  ;;  %vm378_vm15 = vcmp.eq.f32.partialorder %v777_v32, inf  ;;  %v381_v16 = vand.u32 2147483648, %v777_v32 }
 0x1e7   :  { %v410_v40 = vmax.f32 %v406_v37, 0.0  ;;  %v360_v42 = vadd.f32 %v356_v36, %v312_v39  ;;  %v785_v45 = vmax.f32 %v363_v41, 0.0  ;;  %v400_v55 = vmul.f32 2e-06, %v352_v38 }
 0x1e8   :  { %v489_v58 = vadd.f32 %v488_v49, %v487_v54  ;;  %vm380_vm3 = vcmp.eq.f32.partialorder %v777_v32, 0.0  ;;  %v374_v21 = vand.u32 2147483648, %v779_v34 }
 0x1e9   :  { %624 = vrsqrt.f32 %v410_v40  ;;  %v364_v46 = vadd.f32 3.2e-11, %v360_v42  ;;  %vm422_vm14 = vcmp.eq.f32.partialorder %v410_v40, inf  ;;  %v425_v12 = vand.u32 2147483648, %v410_v40 }
 0x1ea   :  { %v349_v43 = vpop.xlane.xlu0 %348  ;;  %626 = vrsqrt.f32 %v785_v45  ;;  %vm424_vm1 = vcmp.eq.f32.partialorder %v410_v40, 0.0  ;;  %vm385_vm6 = vcmp.eq.f32.partialorder %v785_v45, inf  ;;  %v388_v35 = vand.u32 2147483648, %v785_v45 }
 0x1eb   :  { %v399_v47 = vmul.f32 2e-06, %v349_v43  ;;  %v790_v51 = vmax.f32 %v364_v46, 0.0  ;;  %vm387_vm8 = vcmp.eq.f32.partialorder %v785_v45, 0.0 }
 0x1ed   :  { %628 = vrsqrt.f32 %v790_v51  ;;  %vm392_vm10 = vcmp.eq.f32.partialorder %v790_v51, inf  ;;  %v395_v46 = vand.u32 2147483648, %v790_v51 }
 0x1ee   :  { %v325_v50 = vpop.xlane.xlu0 %324 }
 0x1ef   :  { %v403_v52 = vadd.f32 %v399_v47, %v325_v50  ;;  %vm443_vm12 = vcmp.lt.f32.partialorder %v309_v31, %v325_v50 }
 0x1f0   :  { %v560_v53 = vsel %vm443_vm12, 1.0, %v655_v17  ;;  %v619_v60 = vpop.eup %618  ;;  %vm394_vm12 = vcmp.eq.f32.partialorder %v790_v51, 0.0 }
 0x1f1   :  { %v407_v56 = vadd.f32 3.2e-11, %v403_v52  ;;  %v490_v57 = vsel %vm466_vm11, %v560_v53, 0.0  ;;  %v414_v10 = vmul.f32 %v619_v60, %v775_v28 }
 0x1f2   :  { %v328_v59 = vpop.xlane.xlu0 %327  ;;  %v621_v63 = vpop.eup %620  ;;  %v491_v1 = vadd.f32 %v490_v57, %v489_v58 }
 0x1f3   :  { %v411_v61 = vmax.f32 %v407_v56, 0.0  ;;  %v404_v62 = vadd.f32 %v400_v55, %v328_v59  ;;  %vm444_vm13 = vcmp.lt.f32.partialorder %v312_v39, %v328_v59  ;;  %v623_v2 = vpop.eup %622  ;;  %v377_v9 = vmul.f32 %v621_v63, %v777_v32 }
 0x1f4   :  { %v561_v0 = vsel %vm444_vm13, 1.0, %v655_v17  ;;  %v370_v17 = vmul.f32 %v623_v2, %v779_v34  ;;  %v416_v14 = vsel %vm415_vm0, %v775_v28, %v414_v10 }
 0x1f5   :  { %630 = vrsqrt.f32 %v411_v61  ;;  %v408_v4 = vadd.f32 3.2e-11, %v404_v62  ;;  %v492_v5 = vsel %vm466_vm11, %v561_v0, 0.0  ;;  %v379_v13 = vsel %vm378_vm15, %v777_v32, %v377_v9 }
 0x1f6   :  { %v625_v3 = vpop.eup %624  ;;  %v493_v7 = vadd.f32 %v492_v5, %v491_v1  ;;  %v372_v20 = vsel %vm371_vm2, %v779_v34, %v370_v17  ;;  %v382_v22 = vsel %vm380_vm3, %v381_v16, %v379_v13  ;;  %v419_v23 = vsel %vm417_vm4, %v418_v18, %v416_v14 }
 0x1f7   :  { %v798_v8 = vmax.f32 %v408_v4, 0.0  ;;  %v421_v6 = vmul.f32 %v625_v3, %v410_v40  ;;  %v627_v15 = vpop.eup %626  ;;  %v375_v27 = vsel %vm373_vm5, %v374_v21, %v372_v20  ;;  %vm429_vm7 = vcmp.eq.f32.partialorder %v411_v61, inf }
 0x1f8   :  { %494 = vadd.xlane.f32.xlu0 %v493_v7  ;;  %v384_v24 = vmul.f32 %v627_v15, %v785_v45  ;;  %v453_v29 = vsub.f32 %v375_v27, %v419_v23  ;;  %v432_v36 = vand.u32 2147483648, %v411_v61  ;;  %vm431_vm9 = vcmp.eq.f32.partialorder %v411_v61, 0.0 }
 0x1f9   :  { %632 = vrsqrt.f32 %v798_v8  ;;  %v423_v11 = vsel %vm422_vm14, %v410_v40, %v421_v6  ;;  %vm436_vm13 = vcmp.eq.f32.partialorder %v798_v8, inf  ;;  %vm438_vm14 = vcmp.eq.f32.partialorder %v798_v8, 0.0 }
 0x1fa   :  { %v426_v19 = vsel %vm424_vm1, %v425_v12, %v423_v11  ;;  %v629_v26 = vpop.eup %628  ;;  %v386_v31 = vsel %vm385_vm6, %v785_v45, %v384_v24  ;;  %v457_v37 = vadd.f32 1.0, %v453_v29  ;;  %v439_v45 = vand.u32 2147483648, %v798_v8 }
 0x1fb   :  { %v454_v25 = vsub.f32 %v382_v22, %v426_v19  ;;  %v391_v32 = vmul.f32 %v629_v26, %v790_v51  ;;  %v389_v39 = vsel %vm387_vm8, %v388_v35, %v386_v31 }
 0x1fc   :  { %v461_v49 = vmax.f32 %v457_v37, 0.0 }
 0x1fd   :  { %v458_v33 = vadd.f32 1.0, %v454_v25  ;;  %v393_v41 = vsel %vm392_vm10, %v790_v51, %v391_v32 }
 0x1fe   :  { %v396_v50 = vsel %vm394_vm12, %v395_v46, %v393_v41  ;;  %v467_v57 = vsel %vm466_vm11, %v461_v49, 0.0 }
 0x1ff   :  { %v462_v44 = vmax.f32 %v458_v33, 0.0 }
 0x201   :  { %v468_v55 = vsel %vm466_vm11, %v462_v44, 0.0 }
 0x202   :  { %v631_v30 = vpop.eup %630  ;;  %v469_v58 = vadd.f32 %v468_v55, %v467_v57 }
 0x203   :  { %v428_v28 = vmul.f32 %v631_v30, %v411_v61 }
 0x205   :  { %v430_v34 = vsel %vm429_vm7, %v411_v61, %v428_v28 }
 0x206   :  { %v633_v38 = vpop.eup %632  ;;  %v433_v40 = vsel %vm431_vm9, %v432_v36, %v430_v34 }
 0x207   :  { %v435_v42 = vmul.f32 %v633_v38, %v798_v8  ;;  %v455_v43 = vsub.f32 %v389_v39, %v433_v40 }
 0x209   :  { %v437_v47 = vsel %vm436_vm13, %v798_v8, %v435_v42  ;;  %v459_v48 = vadd.f32 1.0, %v455_v43 }
 0x20a   :  { %v440_v52 = vsel %vm438_vm14, %v439_v45, %v437_v47 }
 0x20b   :  { %v456_v53 = vsub.f32 %v396_v50, %v440_v52  ;;  %v463_v54 = vmax.f32 %v459_v48, 0.0 }
 0x20d   :  { %v460_v56 = vadd.f32 1.0, %v456_v53  ;;  %v470_v51 = vsel %vm466_vm11, %v463_v54, 0.0 }
 0x20e   :  { %v471_v60 = vadd.f32 %v470_v51, %v469_v58 }
 0x20f   :  { %v464_v59 = vmax.f32 %v460_v56, 0.0 }
 0x211   :  { %v472_v61 = vsel %vm466_vm11, %v464_v59, 0.0 }
 0x212   :  { %v473_v62 = vadd.f32 %v472_v61, %v471_v60 }
 0x214   :  { %474 = vadd.xlane.f32.xlu1 %v473_v62 }
 0x281   :  { %v495_v63 = vpop.xlane.xlu0 %494 }
 0x282   :  { %v496_v0 = vrot.slane %v495_v63, 4 }
 0x284   :  { %v497_v1 = vadd.f32 %v496_v0, %v495_v63 }
 0x286   :  { %v498_v2 = vrot.slane %v497_v1, 2 }
 0x288   :  { %v499_v7 = vadd.f32 %v498_v2, %v497_v1 }
 0x28a   :  { %v500_v10 = vrot.slane %v499_v7, 1 }
 0x28c   :  { %v501_v11 = vadd.f32 %v500_v10, %v499_v7 }
 0x29d   :  { %v475_v4 = vpop.xlane.xlu1 %474 }
 0x29e   :  { %v476_v5 = vrot.slane %v475_v4, 4 }
 0x2a0   :  { %v477_v3 = vadd.f32 %v476_v5, %v475_v4 }
 0x2a2   :  { %v478_v8 = vrot.slane %v477_v3, 2 }
 0x2a4   :  { %v479_v9 = vadd.f32 %v478_v8, %v477_v3 }
 0x2a6   :  { %v480_v6 = vrot.slane %v479_v9, 1 }
 0x2a8   :  { %v481_v17 = vadd.f32 %v480_v6, %v479_v9 }
 0x2aa   :  { %608 = vpush %v481_v17 }
 0x2ab   :  { %610 = vpush %v501_v11 }
 0x2db   :  { %s609_s0 = spop %608 }
 0x2dc   :  { %s514_s1 = smul.f32 0.03125, %s609_s0  ;;  %s611_s2 = spop %610 }
 0x2dd   :  { %s510_s13 = smul.f32 0.03125, %s611_s2 }
 0x2de   :  { %516 = sst [smem:[#allocation5]] %s514_s1 }
 0x2df   :  { %512 = sst [smem:[#allocation3]] %s510_s13 }
 0x2e0   :  { %524 = dma.smem_to_hbm %s656_s14, 16, %s844_s3, [#allocation4]  }
 0x2e1   :  { %532 = dma.smem_to_hbm %s657_s17, 16, %s845_s4, [#allocation6]  }
 0x2e2   :  { %650 = dma.done.wait [#allocation4], 16  }
 0x2e3   :  { %651 = vsyncadd [#allocation4], 4294967280 }
 0x2e4   :  { %652 = dma.done.wait [#allocation6], 16  }
 0x2e5   :  { %653 = vsyncadd [#allocation6], 4294967280 }
 0x2e6   :  { %539 = sfence }
 0x2e7   :  { %540 = vsyncpa [#allocation4], 1 }
 0x2e8   :  { %541 = vsyncpa [#allocation6], 1 }

</bundles_post_ra>
